<compile_context>
chip_gen: v5e
topology: v5e:2x2
jax: 0.10.0
libtpu: 0.0.40
codegen_flags: <defaults>
</compile_context>

<pallas_src>
import numpy as np

import jax
import jax.numpy as jnp
from jax.experimental import pallas as pl
from jax.experimental.pallas import tpu as pltpu


_MAX_ROW_TILE = 2048          # ~roofline by 512-1024 rows on v5e/v6e; 2048 helps v7x's 3.2 TB/s HBM
_INPUT_VMEM_BUDGET = 8 << 20  # bytes for the two input streams' pipeline buffers (v5e scoped VMEM: 16 MiB)
_INPUT_BUFFERS = 3            # inputs are up-to-triple-buffered (pl.Buffered(3))


# ---------------------------------------------------------------------------
# Kernel: negative L2 distance along the last (lane) axis
# ---------------------------------------------------------------------------
def _neg_l2_kernel(x1_ref, x2_ref, o_ref):
    # Load in the native dtype (bf16 stays bf16 over the DMA); upcast on the VPU.
    d = x1_ref[...].astype(jnp.float32) - x2_ref[...].astype(jnp.float32)
    sumsq = jnp.sum(d * d, axis=-1, keepdims=True)   # XLU cross-lane reduce -> (tile, 1)
    o_ref[...] = -jnp.sqrt(sumsq)                    # sqrt(0)=0, matches torch.norm forward


def _pick_row_tile(m, d, itemsize):
    """Rows per grid step, derived from a VMEM byte budget (not a fixed row count)."""
    per_row = 2 * _INPUT_BUFFERS * d * itemsize      # 2 inputs x pipeline buffers
    tile = max(16, _INPUT_VMEM_BUDGET // per_row)
    tile = min(tile, _MAX_ROW_TILE)
    if m > 32:
        # Keep >= 2 grid steps so megacore / both v7x TensorCores get rows
        # under dimension_semantics=("parallel",).
        tile = min(tile, -(-m // 2))
    tile = min(tile, m)
    return int(max(16, -(-tile // 16) * 16))         # sublane-aligned (covers bf16 packing)


# ---------------------------------------------------------------------------
# Wrapper: flatten leading dims -> (M, D), run one tiled kernel, un-flatten, squeeze
# ---------------------------------------------------------------------------
def siamese_part_distance(x1, x2):
    assert x1.shape == x2.shape, (x1.shape, x2.shape)
    lead = x1.shape[:-1]
    d = x1.shape[-1]
    m = int(np.prod(lead)) if lead else 1

    dt = jnp.result_type(x1.dtype, x2.dtype)
    if not jnp.issubdtype(dt, jnp.floating):
        dt = jnp.float32
    x1f = jnp.asarray(x1).astype(dt).reshape(m, d)   # no f32 upcast for bf16/f16 inputs
    x2f = jnp.asarray(x2).astype(dt).reshape(m, d)

    tile = _pick_row_tile(m, d, jnp.dtype(dt).itemsize)
    num_steps = pl.cdiv(m, tile)                     # padded tail block handles m % tile != 0

    in_spec_kwargs = {}
    if num_steps >= _INPUT_BUFFERS:
        # Almost no compute to hide DMA issue latency behind; deepen the input pipeline.
        in_spec_kwargs = dict(pipeline_mode=pl.Buffered(_INPUT_BUFFERS))
    in_spec = pl.BlockSpec((tile, d), lambda i: (i, 0), **in_spec_kwargs)

    out = pl.pallas_call(
        _neg_l2_kernel,
        out_shape=jax.ShapeDtypeStruct((m, 1), jnp.float32),
        grid=(num_steps,),
        in_specs=[in_spec, in_spec],
        out_specs=pl.BlockSpec((tile, 1), lambda i: (i, 0)),
        compiler_params=pltpu.CompilerParams(
            dimension_semantics=("parallel",)
        ),
    )(x1f, x2f)

    out = out.reshape(lead) if lead else out.reshape(())
    out = jnp.squeeze(out)                           # torch.squeeze: drop all size-1 dims
    return out.astype(dt)


# ---------------------------------------------------------------------------
if __name__ == "__main__":
    key = jax.random.PRNGKey(0)
    k1, k2, k3, k4, k5, k6 = jax.random.split(key, 6)

    # 1) Small Siamese-style input: batch=2, parts=8, embedding dim=128.
    B, P, D = 2, 8, 128
    x1 = jax.random.normal(k1, (B, P, D), jnp.float32)
    x2 = jax.random.normal(k2, (B, P, D), jnp.float32)
    out = jax.block_until_ready(siamese_part_distance(x1, x2))
    ref = jnp.squeeze(-jnp.linalg.norm(x1 - x2, axis=-1))
    assert out.shape == ref.shape == (B, P), out.shape
    assert jnp.allclose(out, ref, rtol=1e-5, atol=1e-4), float(jnp.max(jnp.abs(out - ref)))

    # 2) Larger flat f32 batch whose row count is NOT a multiple of the tile:
    #    exercises the cdiv grid + padded tail block and the Buffered(3) input pipeline.
    M = 5000
    y1 = jax.random.normal(k3, (M, D), jnp.float32)
    y2 = jax.random.normal(k4, (M, D), jnp.float32)
    out_big = jax.block_until_ready(siamese_part_distance(y1, y2))
    ref_big = -jnp.linalg.norm(y1 - y2, axis=-1)
    assert out_big.shape == (M,), out_big.shape
    assert jnp.allclose(out_big, ref_big, rtol=1e-5, atol=1e-4)

    # 3) bf16 inputs stay bf16 through the HBM read (no wrapper f32 upcast).
    z1 = jax.random.normal(k5, (4, 250, D), jnp.float32).astype(jnp.bfloat16)
    z2 = jax.random.normal(k6, (4, 250, D), jnp.float32).astype(jnp.bfloat16)
    out_bf = jax.block_until_ready(siamese_part_distance(z1, z2))
    assert out_bf.dtype == jnp.bfloat16 and out_bf.shape == (4, 250), (out_bf.dtype, out_bf.shape)
    ref_bf = jnp.squeeze(
        -jnp.linalg.norm(z1.astype(jnp.float32) - z2.astype(jnp.float32), axis=-1))
    assert jnp.allclose(out_bf.astype(jnp.float32), ref_bf, rtol=2e-2, atol=2e-2)

    print("KERNEL_OK")
</pallas_src>

<mosaic_0001>
module attributes {stable_mosaic.version = 11 : i64} {
  func.func @_neg_l2_kernel(%arg0: i32, %arg1: memref<16x128xf32, #tpu.memory_space<vmem>>, %arg2: memref<16x128xf32, #tpu.memory_space<vmem>>, %arg3: memref<16x1xf32, #tpu.memory_space<vmem>>) attributes {dimension_semantics = [#tpu.dimension_semantics<parallel>], iteration_bounds = array<i64: 1>, scalar_prefetch = 0 : i64, scratch_operands = 0 : i64, tpu.core_type = #tpu.core_type<tc>, window_params = [{transform_indices = @transform_0, window_bounds = array<i64: 16, 128>}, {transform_indices = @transform_1, window_bounds = array<i64: 16, 128>}, {transform_indices = @transform_2, window_bounds = array<i64: 16, 1>}]} {
    %c0 = arith.constant 0 : index
    %c0_0 = arith.constant 0 : index
    %0 = vector.load %arg1[%c0, %c0_0] : memref<16x128xf32, #tpu.memory_space<vmem>>, vector<16x128xf32>
    %c0_1 = arith.constant 0 : index
    %c0_2 = arith.constant 0 : index
    %1 = vector.load %arg2[%c0_1, %c0_2] : memref<16x128xf32, #tpu.memory_space<vmem>>, vector<16x128xf32>
    %2 = arith.subf %0, %1 : vector<16x128xf32>
    %3 = arith.mulf %2, %2 : vector<16x128xf32>
    %cst = arith.constant dense<0.000000e+00> : vector<16xf32>
    %4 = vector.multi_reduction <add>, %3, %cst [1] : vector<16x128xf32> to vector<16xf32>
    %5 = vector.shape_cast %4 : vector<16xf32> to vector<16x1xf32>
    %6 = math.sqrt %5 : vector<16x1xf32>
    %cst_3 = arith.constant 0.000000e+00 : f32
    %7 = vector.broadcast %cst_3 : f32 to vector<16x1xf32>
    %8 = arith.subf %7, %6 : vector<16x1xf32>
    %c0_4 = arith.constant 0 : index
    %c0_5 = arith.constant 0 : index
    %9 = vector.load %arg3[%c0_4, %c0_5] : memref<16x1xf32, #tpu.memory_space<vmem>>, vector<16x1xf32>
    tpu.vector_store %arg3[%c0_4, %c0_5], %8 {strides = array<i32>} : memref<16x1xf32, #tpu.memory_space<vmem>>, vector<16x1xf32>,
    return
  }
  func.func @transform_0(%arg0: i32) -> (i32, i32) {
    %c0_i32 = arith.constant 0 : i32
    %c0_i32_0 = arith.constant 0 : i32
    return %arg0, %c0_i32 : i32, i32
  }
  func.func @transform_1(%arg0: i32) -> (i32, i32) {
    %c0_i32 = arith.constant 0 : i32
    %c0_i32_0 = arith.constant 0 : i32
    return %arg0, %c0_i32 : i32, i32
  }
  func.func @transform_2(%arg0: i32) -> (i32, i32) {
    %c0_i32 = arith.constant 0 : i32
    %c0_i32_0 = arith.constant 0 : i32
    return %arg0, %c0_i32 : i32, i32
  }
}

</mosaic_0001>

<bundles_post_ra>
// kernel: tpu_custom_call.1
= control target key start
LH: loop header
LB: loop body
LE: loop exit
PB: predicated region body
PF: predicated region fallthrough
CT: control target
= control target key end

     0   :  { %7 = vsyncpa [#allocation3], 0  ;;  %s181_s0 = inlined_call_operand.hbm [shape: f32[16,128], index: 0, kind: input, shape index: {}]   ;;  %s182_s1 = inlined_call_operand.hbm [shape: f32[16,128], index: 1, kind: input, shape index: {}]   ;;  %s183_s2 = inlined_call_operand.vmem [shape: f32[16,1], index: 2, kind: output, shape index: {}]  }
   0x1   :  { %s13_s11 = sshll.u32 %s181_s0, 4  ;;  %s14_s11 = int_to_ptr.hbm [resolvable:$true] %s13_s11 }
   0x2   :  { %8 = vsyncpa [#allocation5], 0  ;;  %s150_s12 = smov [#allocation2]   ;;  %s26_s16 = sshll.u32 %s182_s1, 4  ;;  %s27_s16 = int_to_ptr.hbm [resolvable:$true] %s26_s16 }
   0x3   :  { %s15_s13 = sshll.u32 %s150_s12, 4  ;;  %s151_s17 = smov 128   ;;  %s16_s13 = int_to_ptr.vmem [resolvable:$true] %s15_s13 }
   0x4   :  { %s152_s18 = smov 8   ;;  %s153_s19 = smov [#allocation4]  }
   0x5   :  { %21 = dma.hbm_to_vmem [thread:$0]  %s14_s11, 256, %s16_s13, [#allocation3], %s151_s17, %s151_s17, %s152_s18  }
   0x6   :  { %s28_s20 = sshll.u32 %s153_s19, 4  ;;  %s29_s20 = int_to_ptr.vmem [resolvable:$true] %s28_s20 }
   0x7   :  { %34 = dma.hbm_to_vmem [thread:$0]  %s27_s16, 256, %s29_s20, [#allocation5], %s151_s17, %s151_s17, %s152_s18  }
   0x8   :  { %146 = dma.done.wait [#allocation3], 256  }
   0x9   :  { %147 = vsyncadd [#allocation3], 4294967040 }
   0xa   :  { %148 = dma.done.wait [#allocation5], 256  }
   0xb   :  { %149 = vsyncadd [#allocation5], 4294967040  ;;  %v43_v0 = vld [vmem:[#allocation2] sm:$0xff]  ;;  %v45_v1 = vld [vmem:[#allocation4] sm:$0xff]  ;;  %vm81_vm2 = vcmask 7168  }
   0xc   :  { %v47_v2 = vsub.f32 %v43_v0, %v45_v1  ;;  %v44_v3 = vld [vmem:[#allocation2 + $0x8] sm:$0xff]  ;;  %v46_v4 = vld [vmem:[#allocation4 + $0x8] sm:$0xff] }
   0xd   :  { %v48_v6 = vsub.f32 %v44_v3, %v46_v4 }
   0xe   :  { %v49_v5 = vmul.f32 %v47_v2, %v47_v2 }
   0xf   :  { %v50_v7 = vmul.f32 %v48_v6, %v48_v6 }
  0x10   :  { %51 = vadd.xlane.f32.xlu0 %v49_v5 }
  0x18   :  { %53 = vadd.xlane.f32.xlu0 %v50_v7 }
  0x83   :  { %v52_v8 = vpop.xlane.xlu0 %51 }
  0x84   :  { %94 = vrsqrt.f32 %v52_v8  ;;  %vm62_vm0 = vcmp.eq.f32.partialorder %v52_v8, inf  ;;  %v65_v20 = vand.u32 2147483648, %v52_v8  ;;  %vm64_vm1 = vcmp.eq.f32.partialorder %v52_v8, 0.0 }
  0x8a   :  { %v95_v9 = vpop.eup %94 }
  0x8b   :  { %v56_v10 = vmul.f32 %v95_v9, %v52_v8  ;;  %v54_v11 = vpop.xlane.xlu0 %53 }
  0x8c   :  { %96 = vrsqrt.f32 %v54_v11  ;;  %vm74_vm3 = vcmp.eq.f32.partialorder %v54_v11, inf  ;;  %v77_v28 = vand.u32 2147483648, %v54_v11  ;;  %vm76_vm4 = vcmp.eq.f32.partialorder %v54_v11, 0.0 }
  0x8d   :  { %v57_v12 = vmul.f32 %v95_v9, %v56_v10 }
  0x8f   :  { %v58_v13 = vmul.f32 0.5, %v57_v12 }
  0x91   :  { %v59_v14 = vsub.f32 1.5, %v58_v13 }
  0x92   :  { %v97_v15 = vpop.eup %96 }
  0x93   :  { %v60_v16 = vmul.f32 %v95_v9, %v59_v14  ;;  %v68_v17 = vmul.f32 %v97_v15, %v54_v11 }
  0x95   :  { %v61_v18 = vmul.f32 %v60_v16, %v52_v8  ;;  %v69_v19 = vmul.f32 %v97_v15, %v68_v17 }
  0x97   :  { %v63_v21 = vsel %vm62_vm0, %v52_v8, %v61_v18  ;;  %v70_v22 = vmul.f32 0.5, %v69_v19 }
  0x98   :  { %v66_v23 = vsel %vm64_vm1, %v65_v20, %v63_v21 }
  0x99   :  { %v79_v24 = vsub.f32 0.0, %v66_v23  ;;  %v71_v25 = vsub.f32 1.5, %v70_v22 }
  0x9b   :  { %82 = vst.msk [vmem:[%s183_s2] sm:$0xff] %vm81_vm2, %v79_v24  ;;  %v72_v26 = vmul.f32 %v97_v15, %v71_v25 }
  0x9d   :  { %v73_v27 = vmul.f32 %v72_v26, %v54_v11 }
  0x9f   :  { %v75_v29 = vsel %vm74_vm3, %v54_v11, %v73_v27 }
  0xa0   :  { %v78_v30 = vsel %vm76_vm4, %v77_v28, %v75_v29 }
  0xa1   :  { %v80_v31 = vsub.f32 0.0, %v78_v30 }
  0xa3   :  { %83 = vst.msk [vmem:[%s183_s2 + $0x8] sm:$0xff] %vm81_vm2, %v80_v31 }
  0xa4   :  { %88 = vsyncpa [#allocation3], 1 }
  0xa5   :  { %89 = vsyncpa [#allocation5], 1 }

</bundles_post_ra>
